<compile_context>
chip_gen: v6e
topology: v6e:2x2x1
jax: 0.10.0
libtpu: 0.0.40
codegen_flags: <defaults>
</compile_context>

<pallas_src>
import jax
import jax.numpy as jnp
from jax.experimental import pallas as pl
from jax.experimental.pallas import tpu as pltpu

_MiB = 1024 * 1024


def _round_up(a: int, b: int) -> int:
    return (a + b - 1) // b * b


def _vmem_capacity_bytes() -> int:
    """Physical VMEM of the local TPU (128 MiB on v5e/v6e, 64 MiB on v7x)."""
    try:
        info = pltpu.get_tpu_info()
        cap = getattr(info, "vmem_capacity_bytes", None)
        if cap:
            return int(cap)
    except Exception:
        pass
    return 64 * _MiB  # conservative (v7x-sized) fallback


def _layer_norm_f32(x_ref, gamma_ref, beta_ref):
    """LayerNorm(d_model, eps=1e-6) in f32 (v5e has no bf16 VPU/EUP)."""
    x = x_ref[...].astype(jnp.float32)
    mean = jnp.mean(x, axis=-1, keepdims=True)
    var = jnp.mean(jnp.square(x - mean), axis=-1, keepdims=True)
    xn = (x - mean) * jax.lax.rsqrt(var + 1e-6)
    return xn * gamma_ref[...] + beta_ref[...]


def ffn_kernel_resident(x_ref, gamma_ref, beta_ref, w1_ref, b1_ref, w2_ref,
                        b2_ref, o_ref):
    """Weights fully VMEM-resident: whole d_ffn in one step, no scratch."""
    xn = _layer_norm_f32(x_ref, gamma_ref, beta_ref)
    h = jnp.dot(xn.astype(jnp.bfloat16), w1_ref[...],
                preferred_element_type=jnp.float32) + b1_ref[...]
    h = jnp.maximum(h, 0.0)                                       # ReLU
    y = jnp.dot(h.astype(jnp.bfloat16), w2_ref[...],
                preferred_element_type=jnp.float32)
    # Dropout is identity at inference; residual is the LayerNorm output
    # (matches the PyTorch forward: residual = layer_norm(x)).
    o_ref[...] = (y + b2_ref[...] + xn).astype(o_ref.dtype)


def ffn_kernel_streamed(x_ref, gamma_ref, beta_ref, w1_ref, b1_ref, w2_ref,
                        b2_ref, o_ref, xn_sc, acc_sc):
    """d_ffn streamed along an inner 'arbitrary' grid axis."""
    f = pl.program_id(1)

    @pl.when(f == 0)
    def _():
        xn = _layer_norm_f32(x_ref, gamma_ref, beta_ref)
        xn_sc[...] = xn.astype(jnp.bfloat16)    # one-time bf16 cast (MXU operand)
        acc_sc[...] = xn                        # f32 residual pre-loaded into acc

    h = jnp.dot(xn_sc[...], w1_ref[...],
                preferred_element_type=jnp.float32) + b1_ref[...]
    h = jnp.maximum(h, 0.0)                                       # ReLU
    acc_sc[...] += jnp.dot(h.astype(jnp.bfloat16), w2_ref[...],
                           preferred_element_type=jnp.float32)

    @pl.when(f == pl.num_programs(1) - 1)
    def _():
        o_ref[...] = (acc_sc[...] + b2_ref[...]).astype(o_ref.dtype)


def feed_forward(x, w1, b1, w2, b2, gamma, beta):
    """x: (batch, seq, d_model).
       w1: (d_model, d_ffn), b1: (d_ffn,), w2: (d_ffn, d_model), b2: (d_model,),
       gamma/beta: (d_model,)."""
    B, S, D = x.shape
    F = w1.shape[1]
    N = B * S
    itemsize = jnp.dtype(x.dtype).itemsize

    vmem_cap = _vmem_capacity_bytes()
    # 96 MiB on 128 MiB parts (v5e/v6e); 48 MiB on v7x's 64 MiB VMEM.
    vmem_limit = int(min(vmem_cap * 3 // 4, 112 * _MiB))

    f_base = _round_up(F, 128)

    # --- weights-resident fast path decision -------------------------------
    # Budget bf16 W1 + W2 at 2x (BlockSpec double-buffers inputs).
    w_resident_bytes = 2 * (2 * D * f_base * 2)
    resident = w_resident_bytes <= int(0.6 * vmem_limit)

    if resident:
        tile_f = f_base
        tile_m_target = 512
    else:
        # Streamed weights: arithmetic intensity ~ tile_m FLOPs per weight byte
        # (ridge ~715 FLOP/B on v6e, ~310 on v7x, ~240 on v5e) -> big row tiles.
        big_vmem = vmem_cap >= 96 * _MiB
        tile_f = min(f_base, 1024 if big_vmem else 512)
        tile_m_target = 1024 if big_vmem else 512

    N8 = _round_up(N, 8)
    tile_m = min(tile_m_target, N8)
    # Keep >= 2 row tiles when rows allow, so the "parallel" row axis can shard
    # across v7x's two TensorCores.
    if tile_m >= N8 and N8 >= 16:
        tile_m = _round_up(N8 // 2, 8)

    def row_bytes(tm):
        b = 2 * tm * D * itemsize            # x tiles, double-buffered
        b += 2 * tm * D * itemsize           # out tiles, double-buffered
        if not resident:
            b += tm * D * (2 + 4)            # bf16 xn scratch + f32 accumulator
        return b

    def weight_bytes(tf):
        # W1 + W2 tiles (bf16, x2 buf) + b1 (f32, x2 buf) + gamma/beta/b2 (x2 buf)
        return 2 * (2 * D * tf * 2) + 2 * 4 * tf + 2 * 4 * 3 * D

    # Shrink tiles until the working set fits the per-generation VMEM budget.
    while row_bytes(tile_m) + weight_bytes(tile_f) > vmem_limit and tile_m > 8:
        tile_m = max(8, _round_up(tile_m // 2, 8))
    while (not resident) and tile_f > 128 and \
            row_bytes(tile_m) + weight_bytes(tile_f) > vmem_limit:
        tile_f = max(128, _round_up(tile_f // 2, 128))

    n_tiles = -(-N // tile_m)
    n_pad = n_tiles * tile_m
    f_tiles = -(-f_base // tile_f)
    f_pad = f_tiles * tile_f

    x2 = x.reshape(N, D)
    if n_pad != N:
        x2 = jnp.pad(x2, ((0, n_pad - N), (0, 0)))   # padded rows dropped at the end

    # Weights as bf16 in HBM (halves DMA bytes / VMEM residency). Zero-padded F
    # contributes exactly zero (zero W1 columns / b1 entries / W2 rows).
    w1p = jnp.pad(w1, ((0, 0), (0, f_pad - F))).astype(jnp.bfloat16)
    w2p = jnp.pad(w2, ((0, f_pad - F), (0, 0))).astype(jnp.bfloat16)
    b1p = jnp.pad(b1, (0, f_pad - F)).reshape(1, f_pad).astype(jnp.float32)
    b2_2 = b2.reshape(1, D).astype(jnp.float32)
    g2 = gamma.reshape(1, D).astype(jnp.float32)
    be2 = beta.reshape(1, D).astype(jnp.float32)

    # HBM traffic: weights fetched once (resident) or once per row tile (streamed).
    weight_stream_factor = 1 if resident else n_tiles
    cost = pl.CostEstimate(
        flops=4 * n_pad * D * f_pad,                         # two matmuls
        transcendentals=n_pad,                               # rsqrt per row
        bytes_accessed=(2 * n_pad * D * itemsize             # x in + out
                        + weight_stream_factor * (2 * 2 * D * f_pad + 4 * f_pad)
                        + 4 * 3 * D),                        # gamma, beta, b2
    )

    if resident:
        grid = (n_tiles,)
        in_specs = [
            pl.BlockSpec((tile_m, D), lambda i: (i, 0)),      # x row tile
            pl.BlockSpec((1, D), lambda i: (0, 0)),           # gamma
            pl.BlockSpec((1, D), lambda i: (0, 0)),           # beta
            pl.BlockSpec((D, f_pad), lambda i: (0, 0)),       # W1 (resident)
            pl.BlockSpec((1, f_pad), lambda i: (0, 0)),       # b1 (resident)
            pl.BlockSpec((f_pad, D), lambda i: (0, 0)),       # W2 (resident)
            pl.BlockSpec((1, D), lambda i: (0, 0)),           # b2
        ]
        out_specs = pl.BlockSpec((tile_m, D), lambda i: (i, 0))
        scratch_shapes = []
        kernel = ffn_kernel_resident
        dim_sem = ("parallel",)
    else:
        grid = (n_tiles, f_tiles)
        in_specs = [
            pl.BlockSpec((tile_m, D), lambda i, f: (i, 0)),   # x row tile
            pl.BlockSpec((1, D), lambda i, f: (0, 0)),        # gamma
            pl.BlockSpec((1, D), lambda i, f: (0, 0)),        # beta
            pl.BlockSpec((D, tile_f), lambda i, f: (0, f)),   # W1 F-tile
            pl.BlockSpec((1, tile_f), lambda i, f: (0, f)),   # b1 F-tile
            pl.BlockSpec((tile_f, D), lambda i, f: (f, 0)),   # W2 F-tile
            pl.BlockSpec((1, D), lambda i, f: (0, 0)),        # b2
        ]
        out_specs = pl.BlockSpec((tile_m, D), lambda i, f: (i, 0))
        scratch_shapes = [
            pltpu.VMEM((tile_m, D), jnp.bfloat16),   # LN output (MXU operand)
            pltpu.VMEM((tile_m, D), jnp.float32),    # f32 acc (seeded with residual)
        ]
        kernel = ffn_kernel_streamed
        dim_sem = ("parallel", "arbitrary")

    out = pl.pallas_call(
        kernel,
        out_shape=jax.ShapeDtypeStruct((n_pad, D), x.dtype),
        grid_spec=pltpu.PrefetchScalarGridSpec(
            num_scalar_prefetch=0,
            grid=grid,
            in_specs=in_specs,
            out_specs=out_specs,
            scratch_shapes=scratch_shapes,
        ),
        compiler_params=pltpu.CompilerParams(
            dimension_semantics=dim_sem,
            vmem_limit_bytes=vmem_limit,
        ),
        cost_estimate=cost,
    )(x2, g2, be2, w1p, b1p, w2p, b2_2)
    return out[:N].reshape(B, S, D)


def reference(x, w1, b1, w2, b2, gamma, beta):
    xf = x.astype(jnp.float32)
    mean = jnp.mean(xf, axis=-1, keepdims=True)
    var = jnp.mean(jnp.square(xf - mean), axis=-1, keepdims=True)
    xn = (xf - mean) / jnp.sqrt(var + 1e-6) * gamma + beta
    h = jnp.maximum(xn @ w1 + b1, 0.0)
    y = h @ w2 + b2
    return (y + xn).astype(x.dtype)


if __name__ == "__main__":
    key = jax.random.PRNGKey(0)
    B, S, d_model, d_ffn = 2, 8, 128, 256   # small but lane-dense (multiples of 128)

    k = jax.random.split(key, 7)
    x = jax.random.normal(k[0], (B, S, d_model), dtype=jnp.float32)
    lim1 = 1.0 / d_model ** 0.5
    lim2 = 1.0 / d_ffn ** 0.5
    w1 = jax.random.uniform(k[1], (d_model, d_ffn), jnp.float32, -lim1, lim1)
    b1 = jax.random.uniform(k[2], (d_ffn,), jnp.float32, -lim1, lim1)
    w2 = jax.random.uniform(k[3], (d_ffn, d_model), jnp.float32, -lim2, lim2)
    b2 = jax.random.uniform(k[4], (d_model,), jnp.float32, -lim2, lim2)
    gamma = 1.0 + 0.1 * jax.random.normal(k[5], (d_model,), dtype=jnp.float32)
    beta = 0.1 * jax.random.normal(k[6], (d_model,), dtype=jnp.float32)

    out = feed_forward(x, w1, b1, w2, b2, gamma, beta)
    out = jax.block_until_ready(out)

    ref = reference(x, w1, b1, w2, b2, gamma, beta)
    assert out.shape == (B, S, d_model)
    # bf16 MXU operands with f32 accumulation -> loosened tolerance vs pure-f32 reference.
    assert jnp.allclose(out, ref, atol=5e-2, rtol=5e-2), "mismatch vs reference"
    print("KERNEL_OK")
</pallas_src>

<mosaic_0001>
module attributes {stable_mosaic.version = 11 : i64} {
  func.func @ffn_kernel_resident(%arg0: i32, %arg1: memref<8x128xf32, #tpu.memory_space<vmem>>, %arg2: memref<1x128xf32, #tpu.memory_space<vmem>>, %arg3: memref<1x128xf32, #tpu.memory_space<vmem>>, %arg4: memref<128x256xbf16, #tpu.memory_space<vmem>>, %arg5: memref<1x256xf32, #tpu.memory_space<vmem>>, %arg6: memref<256x128xbf16, #tpu.memory_space<vmem>>, %arg7: memref<1x128xf32, #tpu.memory_space<vmem>>, %arg8: memref<8x128xf32, #tpu.memory_space<vmem>>) attributes {dimension_semantics = [#tpu.dimension_semantics<parallel>], iteration_bounds = array<i64: 2>, scalar_prefetch = 0 : i64, scratch_operands = 0 : i64, tpu.core_type = #tpu.core_type<tc>, window_params = [{transform_indices = @transform_0, window_bounds = array<i64: 8, 128>}, {pipeline_mode = #tpu.pipeline_mode<synchronous>, transform_indices = @transform_1, window_bounds = array<i64: 1, 128>}, {pipeline_mode = #tpu.pipeline_mode<synchronous>, transform_indices = @transform_2, window_bounds = array<i64: 1, 128>}, {pipeline_mode = #tpu.pipeline_mode<synchronous>, transform_indices = @transform_3, window_bounds = array<i64: 128, 256>}, {pipeline_mode = #tpu.pipeline_mode<synchronous>, transform_indices = @transform_4, window_bounds = array<i64: 1, 256>}, {pipeline_mode = #tpu.pipeline_mode<synchronous>, transform_indices = @transform_5, window_bounds = array<i64: 256, 128>}, {pipeline_mode = #tpu.pipeline_mode<synchronous>, transform_indices = @transform_6, window_bounds = array<i64: 1, 128>}, {transform_indices = @transform_7, window_bounds = array<i64: 8, 128>}]} {
    %c0 = arith.constant 0 : index
    %c0_0 = arith.constant 0 : index
    %0 = vector.load %arg1[%c0, %c0_0] : memref<8x128xf32, #tpu.memory_space<vmem>>, vector<8x128xf32>
    %cst = arith.constant dense<0.000000e+00> : vector<8xf32>
    %1 = vector.multi_reduction <add>, %0, %cst [1] : vector<8x128xf32> to vector<8xf32>
    %2 = vector.shape_cast %1 : vector<8xf32> to vector<8x1xf32>
    %cst_1 = arith.constant 1.280000e+02 : f32
    %3 = vector.broadcast %cst_1 : f32 to vector<8x1xf32>
    %4 = arith.divf %2, %3 : vector<8x1xf32>
    %5 = vector.broadcast %4 : vector<8x1xf32> to vector<8x128xf32>
    %6 = arith.subf %0, %5 : vector<8x128xf32>
    %7 = arith.mulf %6, %6 : vector<8x128xf32>
    %cst_2 = arith.constant dense<0.000000e+00> : vector<8xf32>
    %8 = vector.multi_reduction <add>, %7, %cst_2 [1] : vector<8x128xf32> to vector<8xf32>
    %9 = vector.shape_cast %8 : vector<8xf32> to vector<8x1xf32>
    %cst_3 = arith.constant 1.280000e+02 : f32
    %10 = vector.broadcast %cst_3 : f32 to vector<8x1xf32>
    %11 = arith.divf %9, %10 : vector<8x1xf32>
    %12 = vector.broadcast %4 : vector<8x1xf32> to vector<8x128xf32>
    %13 = arith.subf %0, %12 : vector<8x128xf32>
    %cst_4 = arith.constant 9.99999997E-7 : f32
    %14 = vector.broadcast %cst_4 : f32 to vector<8x1xf32>
    %15 = arith.addf %11, %14 : vector<8x1xf32>
    %16 = math.rsqrt %15 : vector<8x1xf32>
    %17 = vector.broadcast %16 : vector<8x1xf32> to vector<8x128xf32>
    %18 = arith.mulf %13, %17 : vector<8x128xf32>
    %c0_5 = arith.constant 0 : index
    %c0_6 = arith.constant 0 : index
    %19 = vector.load %arg2[%c0_5, %c0_6] : memref<1x128xf32, #tpu.memory_space<vmem>>, vector<1x128xf32>
    %20 = vector.broadcast %19 : vector<1x128xf32> to vector<8x128xf32>
    %21 = arith.mulf %18, %20 : vector<8x128xf32>
    %c0_7 = arith.constant 0 : index
    %c0_8 = arith.constant 0 : index
    %22 = vector.load %arg3[%c0_7, %c0_8] : memref<1x128xf32, #tpu.memory_space<vmem>>, vector<1x128xf32>
    %23 = vector.broadcast %22 : vector<1x128xf32> to vector<8x128xf32>
    %24 = arith.addf %21, %23 : vector<8x128xf32>
    %25 = arith.truncf %24 : vector<8x128xf32> to vector<8x128xbf16>
    %c0_9 = arith.constant 0 : index
    %c0_10 = arith.constant 0 : index
    %26 = vector.load %arg4[%c0_9, %c0_10] : memref<128x256xbf16, #tpu.memory_space<vmem>>, vector<128x256xbf16>
    %cst_11 = arith.constant dense<0.000000e+00> : vector<8x256xf32>
    %27 = tpu.matmul %25, %26, %cst_11 {dimension_numbers = #tpu.dot_dimension_numbers<[1], [0], [0], [1], [0, 0, 1, 1], [], []>} : vector<8x128xbf16>, vector<128x256xbf16>, vector<8x256xf32> -> vector<8x256xf32>
    %c0_12 = arith.constant 0 : index
    %c0_13 = arith.constant 0 : index
    %28 = vector.load %arg5[%c0_12, %c0_13] : memref<1x256xf32, #tpu.memory_space<vmem>>, vector<1x256xf32>
    %29 = vector.broadcast %28 : vector<1x256xf32> to vector<8x256xf32>
    %30 = arith.addf %27, %29 : vector<8x256xf32>
    %cst_14 = arith.constant 0.000000e+00 : f32
    %31 = vector.broadcast %cst_14 : f32 to vector<8x256xf32>
    %32 = arith.maximumf %30, %31 : vector<8x256xf32>
    %33 = arith.truncf %32 : vector<8x256xf32> to vector<8x256xbf16>
    %c0_15 = arith.constant 0 : index
    %c0_16 = arith.constant 0 : index
    %34 = vector.load %arg6[%c0_15, %c0_16] : memref<256x128xbf16, #tpu.memory_space<vmem>>, vector<256x128xbf16>
    %cst_17 = arith.constant dense<0.000000e+00> : vector<8x128xf32>
    %35 = tpu.matmul %33, %34, %cst_17 {dimension_numbers = #tpu.dot_dimension_numbers<[1], [0], [0], [1], [0, 0, 1, 1], [], []>} : vector<8x256xbf16>, vector<256x128xbf16>, vector<8x128xf32> -> vector<8x128xf32>
    %c0_18 = arith.constant 0 : index
    %c0_19 = arith.constant 0 : index
    %36 = vector.load %arg7[%c0_18, %c0_19] : memref<1x128xf32, #tpu.memory_space<vmem>>, vector<1x128xf32>
    %37 = vector.broadcast %36 : vector<1x128xf32> to vector<8x128xf32>
    %38 = arith.addf %35, %37 : vector<8x128xf32>
    %39 = arith.addf %38, %24 : vector<8x128xf32>
    %c0_20 = arith.constant 0 : index
    %c0_21 = arith.constant 0 : index
    %40 = vector.load %arg8[%c0_20, %c0_21] : memref<8x128xf32, #tpu.memory_space<vmem>>, vector<8x128xf32>
    tpu.vector_store %arg8[%c0_20, %c0_21], %39 {strides = array<i32>} : memref<8x128xf32, #tpu.memory_space<vmem>>, vector<8x128xf32>,
    return
  }
  func.func @transform_0(%arg0: i32) -> (i32, i32) {
    %c0_i32 = arith.constant 0 : i32
    %c0_i32_0 = arith.constant 0 : i32
    return %arg0, %c0_i32 : i32, i32
  }
  func.func @transform_1(%arg0: i32) -> (i32, i32) {
    %c0_i32 = arith.constant 0 : i32
    %c0_i32_0 = arith.constant 0 : i32
    %c0_i32_1 = arith.constant 0 : i32
    return %c0_i32, %c0_i32_0 : i32, i32
  }
  func.func @transform_2(%arg0: i32) -> (i32, i32) {
    %c0_i32 = arith.constant 0 : i32
    %c0_i32_0 = arith.constant 0 : i32
    %c0_i32_1 = arith.constant 0 : i32
    return %c0_i32, %c0_i32_0 : i32, i32
  }
  func.func @transform_3(%arg0: i32) -> (i32, i32) {
    %c0_i32 = arith.constant 0 : i32
    %c0_i32_0 = arith.constant 0 : i32
    %c0_i32_1 = arith.constant 0 : i32
    return %c0_i32, %c0_i32_0 : i32, i32
  }
  func.func @transform_4(%arg0: i32) -> (i32, i32) {
    %c0_i32 = arith.constant 0 : i32
    %c0_i32_0 = arith.constant 0 : i32
    %c0_i32_1 = arith.constant 0 : i32
    return %c0_i32, %c0_i32_0 : i32, i32
  }
  func.func @transform_5(%arg0: i32) -> (i32, i32) {
    %c0_i32 = arith.constant 0 : i32
    %c0_i32_0 = arith.constant 0 : i32
    %c0_i32_1 = arith.constant 0 : i32
    return %c0_i32, %c0_i32_0 : i32, i32
  }
  func.func @transform_6(%arg0: i32) -> (i32, i32) {
    %c0_i32 = arith.constant 0 : i32
    %c0_i32_0 = arith.constant 0 : i32
    %c0_i32_1 = arith.constant 0 : i32
    return %c0_i32, %c0_i32_0 : i32, i32
  }
  func.func @transform_7(%arg0: i32) -> (i32, i32) {
    %c0_i32 = arith.constant 0 : i32
    %c0_i32_0 = arith.constant 0 : i32
    return %arg0, %c0_i32 : i32, i32
  }
}

</mosaic_0001>

<bundles_post_ra>
// kernel: tpu_custom_call.1
= control target key start
LH: loop header
LB: loop body
LE: loop exit
PB: predicated region body
PF: predicated region fallthrough
CT: control target
= control target key end

     0   :  { %s1436_s0 = inlined_call_operand.hbm [shape: f32[16,128], index: 0, kind: input, shape index: {}]   ;;  %s1437_s1 = inlined_call_operand.vmem [shape: f32[1,128], index: 1, kind: input, shape index: {}]   ;;  %s1438_s2 = inlined_call_operand.hbm [shape: f32[1,128], index: 2, kind: input, shape index: {}]   ;;  %s1439_s3 = inlined_call_operand.hbm [shape: bf16[128,256], index: 3, kind: input, shape index: {}]   ;;  %s1440_s4 = inlined_call_operand.vmem [shape: f32[1,256], index: 4, kind: input, shape index: {}]   ;;  %s1441_s5 = inlined_call_operand.hbm [shape: bf16[256,128], index: 5, kind: input, shape index: {}]   ;;  %s1442_s6 = inlined_call_operand.vmem [shape: f32[1,128], index: 6, kind: input, shape index: {}]   ;;  %s1443_s7 = inlined_call_operand.hbm [shape: f32[16,128], index: 7, kind: output, shape index: {}]  }
   0x1   :  { %1448 = sst [smem:[#allocation15_spill]] %s1438_s2 }
   0x2   :  { %1449 = sst [smem:[#allocation16_spill]] %s1439_s3 }
   0x3   :  { %12 = vsyncpa [#allocation3], 0 }
   0x4   :  { %14 = vsyncpa [#allocation3 + $0x1], 0 }
   0x5   :  { %15 = vsyncpa [#allocation6], 0 }
   0x6   :  { %16 = vsyncpa [#allocation9], 0 }
   0x7   :  { %17 = vsyncpa [#allocation4], 0 }
   0x8   :  { %19 = vsyncpa [#allocation4 + $0x1], 0  ;;  %s1239_s24 = smov 0   ;;  %s1241_s25 = smov 0  }
   0x9   :  { %s1243_s26 = smov 0   ;;  %s1245_s27 = smov 0  }
   0xa LB: > { %s1260_s28 = sadd.s32 4294967295, %s1187_s27   ;;  %s810_s29 = sadd.s32 4294967294, %s1187_s27   ;;  %s1187_s27 = sphi %s1245_s27, %s1470_s27   ;;  %s1183_s26 = sphi %s1243_s26, %s1469_s26   ;;  %s1179_s25 = sphi %s1241_s25, %s1468_s25   ;;  %s1175_s24 = sphi %s1239_s24, %s1467_s24  }
   0xb   : > { %p45_p0 = scmp.ne.s32.totalorder %s1179_s25, %s1175_s24  ;;  %p1444_p1 = scmp.eq.s32.totalorder %s1260_s28, 0 }
   0xc   : > { %p195_p2 = scmp.eq.s32.totalorder %s1260_s28, 1  ;;  %p201_p3 = scmp.eq.s32.totalorder %s810_s29, 1 }
   0xd   : > { %p1269_p4 = por %p1444_p1, %p45_p0  ;;  %p811_p5 = scmp.ge.s32.totalorder %s1187_s27, 1 }
   0xe   : > { %p1274_p6 = por %p201_p3, %p45_p0  ;;  %p208_p7 = scmp.lt.s32.totalorder %s1187_s27, 3 }
   0xf   : > { %s1450_s30 = scalar_select %p1269_p4, 1, 0 }
  0x10   : > { %s1451_s8 = scalar_select %p1274_p6, 1, 0 }
  0x11   : > { %p1279_p8 = pnand %p811_p5, %p208_p7  ;;  %s1189_s10 = smov [#allocation5]  }
  0x12   : > { %s224_s11 = sshll.u32 %s1189_s10, 4  ;;  %s1190_s12 = smov [#allocation7]   ;;  %s225_s11 = int_to_ptr.vmem [resolvable:$true] %s224_s11 }
  0x13   : > { %s1452_s9 = scalar_select %p1279_p8, 1, 0 }
  0x14   : > { %p901_p10 = pneg %p1279_p8  ;;  %s234_s13 = sshll.u32 %s1190_s12, 4  ;;  %s1292_s13 = int_to_ptr.vmem [resolvable:$true] %s234_s13 }
  0x15   : > { %s1191_s15 = smov [#allocation8]   ;;  %s1020_s17 = scalar_lea.vmem %s225_s11, 16 }
  0x16   : > { %p1288_p11 = pnand %p901_p10, %p1444_p1  ;;  %s250_s16 = sshll.u32 %s1191_s15, 4  ;;  %s251_s16 = int_to_ptr.vmem [resolvable:$true] %s250_s16 }
  0x17   : > { %p1021_p13 = scmp.ne.s32.totalorder %s225_s11, %s1020_s17  ;;  %s1027_s18 = scalar_lea.vmem %s225_s11, 32 }
  0x18   : > { %p1011_p12 = pneg %p1288_p11  ;;  %p1028_p5 = scmp.lt.s32.totalorder %s225_s11, %s225_s11 }
  0x19   : > { %p1029_p7 = scmp.lt.s32.totalorder %s1027_s18, %s1020_s17 }
  0x1a   : > { %p1023_p0 = pnand %p1021_p13, %p1011_p12 }
  0x1b   : > { %p1030_p10 = por %p1029_p7, %p1028_p5 }
  0x1c   : > { %p1024_p3 = pneg %p1023_p0 }
  0x1e   : > { %p1031_p9 = pnand %p1030_p10, %p1024_p3 }
  0x20   : > { %1034 = shalt.err (!%p1031_p9)
}
  0x21   : > { %s1454_s2 = sld [smem:[#allocation15_spill]]  ;;  %s1046_s21 = scalar_lea.vmem %s1292_s13, 2048 }
  0x22   : > { %p1047_p1 = scmp.ne.s32.totalorder %s1292_s13, %s1046_s21  ;;  %p1054_p5 = scmp.lt.s32.totalorder %s1292_s13, %s1292_s13 }
  0x23   : > { %p1055_p3 = scmp.lt.s32.totalorder %s1046_s21, %s1046_s21 }
  0x24   : > { %p1049_p13 = pnand %p1047_p1, %p1011_p12 }
  0x25   : > { %p1056_p9 = por %p1055_p3, %p1054_p5 }
  0x26   : > { %p1050_p0 = pneg %p1049_p13 }
  0x27   : > { %904 = dma.hbm_to_vmem [thread:$0]  (!%p1288_p11), %s1454_s2, 16, %s225_s11, [#allocation6]  }
  0x28   : > { %p1057_p7 = pnand %p1056_p9, %p1050_p0 }
  0x2a   : > { %1060 = shalt.err (!%p1057_p7)
}
  0x2b   : > { %s1192_s22 = smov 128   ;;  %s1193_s23 = smov 8  }
  0x2c   : > { %s1455_s3 = sld [smem:[#allocation16_spill]]  ;;  %s1072_s11 = scalar_lea.vmem %s251_s16, 2048 }
  0x2d   : > { %p1073_p1 = scmp.ne.s32.totalorder %s251_s16, %s1072_s11  ;;  %p1080_p5 = scmp.lt.s32.totalorder %s251_s16, %s251_s16 }
  0x2e   : > { %p1081_p0 = scmp.lt.s32.totalorder %s1072_s11, %s1072_s11 }
  0x2f   : > { %p1075_p10 = pnand %p1073_p1, %p1011_p12 }
  0x30   : > { %p1082_p3 = por %p1081_p0, %p1080_p5 }
  0x31   : > { %p1076_p13 = pneg %p1075_p10 }
  0x32   : > { %907 = dma.hbm_to_vmem [thread:$0]  (!%p1288_p11), %s1455_s3, 2048, %s1292_s13, [#allocation6], %s1192_s22, %s1192_s22, %s1193_s23  }
  0x33   : > { %p1083_p9 = pnand %p1082_p3, %p1076_p13 }
  0x35   : > { %1086 = shalt.err (!%p1083_p9)
}
  0x36   : > { %s1194_s12 = smov 64   ;;  %s1195_s13 = smov 4  }
  0x37   : > { %910 = dma.hbm_to_vmem [thread:$0]  (!%p1288_p11), %s1441_s5, 2048, %s251_s16, [#allocation9], %s1194_s12, %s1194_s12, %s1195_s13  }
  0x38   : > { %s1326_s18 = sadd.s32 1, %s1187_s27   ;;  %s32_s20 = sadd.s32 1, %s1183_s26 }
  0x39   : > { %s29_s19 = ssub.s32 %s1187_s27, %s1326_s18  ;;  %p39_p7 = scmp.ne.s32.totalorder %s1183_s26, %s1179_s25 }
  0x3a   : > { %p30_p12 = scmp.eq.s32.totalorder %s29_s19, 0  ;;  %p40_p1 = scmp.eq.s32.totalorder %s1187_s27, 0 }
  0x3b   : > { %p922_p10 = scmp.lt.s32.totalorder %s1187_s27, 2  ;;  %p1340_p5 = por %p195_p2, %p39_p7 }
  0x3c   : > { %s1336_s21 = scalar_select %p30_p12, %s1183_s26, %s32_s20  }
  0x3d   : > { %p41_p13 = por %p40_p1, %p39_p7  ;;  %s267_s14 = sand.u32 1, %s1183_s26  }
  0x3e   : > { %s1456_s22 = scalar_select %p1340_p5, 1, 0 }
  0x3f   : > { %s817_s23 = sshll.u32 %s1187_s27, 7  ;;  %s816_s16 = sshll.u32 %s267_s14, 3 }
  0x40   : > { %s1349_s11 = scalar_lea.hbm %s1436_s0, %s817_s23  ;;  %s271_s12 = scalar_lea.vmem [#allocation2], %s816_s16 }
  0x41   : > { %s278_s13 = sshll.u32 %s271_s12, 4  ;;  %p1351_p11 = pnand %p922_p10, %p41_p13  ;;  %s279_s13 = int_to_ptr.vmem [resolvable:$true] %s278_s13 }
  0x42   : > { %s268_s17 = scalar_lea.sflag [#allocation3], %s267_s14  ;;  %s1087_s19 = scalar_lea.hbm %s1349_s11, 128 }
  0x43   : > { %p1088_p2 = scmp.ne.s32.totalorder %s1349_s11, %s1087_s19  ;;  %p1089_p0 = pneg %p1351_p11 }
  0x44   : > { %s1092_s29 = scalar_lea.hbm %s1436_s0, 256  ;;  %p1093_p12 = scmp.lt.s32.totalorder %s1349_s11, %s1436_s0 }
  0x45   : > { %p1090_p3 = pnand %p1089_p0, %p1088_p2  ;;  %p1094_p7 = scmp.lt.s32.totalorder %s1092_s29, %s1087_s19 }
  0x47   : > { %p1091_p9 = pneg %p1090_p3  ;;  %p1095_p1 = por %p1094_p7, %p1093_p12 }
  0x49   : > { %p1096_p10 = pnand %p1095_p1, %p1091_p9 }
  0x4b   : > { %1099 = shalt.err (!%p1096_p10)
}
  0x4c   : > { %s1100_s12 = scalar_lea.vmem %s279_s13, 128  ;;  %s1196_s14 = smov [#allocation2]  }
  0x4d   : > { %p1101_p13 = scmp.ne.s32.totalorder %s279_s13, %s1100_s12  ;;  %s1105_s2 = sshll.u32 %s1196_s14, 4  ;;  %s1106_s2 = int_to_ptr.vmem [resolvable:$false] %s1105_s2 }
  0x4e   : > { %s1107_s3 = scalar_lea.vmem %s1106_s2, 256  ;;  %p1108_p2 = scmp.lt.s32.totalorder %s279_s13, %s1106_s2 }
  0x4f   : > { %p1103_p6 = pnand %p1101_p13, %p1089_p0  ;;  %p1109_p3 = scmp.lt.s32.totalorder %s1107_s3, %s1100_s12 }
  0x51   : > { %p1104_p5 = pneg %p1103_p6  ;;  %p1110_p4 = por %p1109_p3, %p1108_p2 }
  0x53   : > { %p1111_p8 = pnand %p1110_p4, %p1104_p5 }
  0x55   : > { %1114 = shalt.err (!%p1111_p8)
}
  0x56   : > { %914 = dma.hbm_to_vmem [thread:$0]  (!%p1351_p11), %s1349_s11, 128, %s279_s13, %s268_s17  }
  0x57   : > { %p1458_p9 = scmp.ne.s32.totalorder %s1452_s9, 0 }
  0x58   : > { %s1372_s19 = sand.u32 (!%p1458_p9), 1, %s1179_s25   ;;  %p1459_p4 = scmp.ne.s32.totalorder (!%p1458_p9), %s1450_s30, 0 }
  0x59   : > { %287 = sbr.rel (%p1458_p9) target bundleno = 826 (0x33a), region = 48  ;;  %s819_s20 = sshll.u32 (!%p1458_p9), %s1372_s19, 3 }
  0x5a   : > { %s290_s2 = scalar_lea.sflag (!%p1458_p9), [#allocation3], %s1372_s19  ;;  %s293_s3 = scalar_lea.vmem (!%p1458_p9), [#allocation2], %s819_s20 }
  0x5e   : > { %1158 = dma.done.wait (%p1459_p4), %s290_s2, 128  }
  0x5f   : > { %1160 = vsyncadd (%p1459_p4), %s290_s2, 4294967168  ;;  %p1460_p6 = scmp.eq.s32.totalorder %s1260_s28, 0 }
  0x61   : > { %1162 = dma.done.wait (%p1460_p6), [#allocation6], 2064   ;;  %p1461_p8 = pmov %p1460_p6 }
  0x62   : > { %p1462_p5 = pmov %p1460_p6 }
  0x63   : > { %1164 = vsyncadd (%p1461_p8), [#allocation6], 4294965232 }
  0x64   : > { %1166 = dma.done.wait (%p1462_p5), [#allocation9], 2048   ;;  %p1463_p11 = pmov %p1462_p5 }
  0x65   : > { %v337_v0 = vld [vmem:[%s293_s3] sm:$0xff]  ;;  %v972_v4 = vld [vmem:[#allocation7 + $0x60] ss:$8 sps:$4 sm:$0xff]   ;;  %v1197_v16 = vmov 0   ;;  %v825_v40 = vld [vmem:[#allocation5] ss:$0 sm:$0xff]  ;;  %v385_v48 = vlaneseq }
  0x66   : > { %1168 = vsyncadd (%p1463_p11), [#allocation9], 4294965248  ;;  %338 = vadd.xlane.f32.xlu0 %v337_v0  ;;  %v967_v1 = vld [vmem:[#allocation7 + $0x74] ss:$8 sps:$4 sm:$0xff]   ;;  %v969_v2 = vld [vmem:[#allocation7 + $0x70] ss:$8 sps:$4 sm:$0xff]   ;;  %507 = vmatprep.mubr.bf16.mxu0 %v1197_v16 }
  0x67   : > { %v970_v3 = vld [vmem:[#allocation7 + $0x64] ss:$8 sps:$4 sm:$0xff]   ;;  %475 = vmatprep.subr.bf16.mxu0 %v967_v1  ;;  %v973_v9 = vld [vmem:[#allocation7 + $0x54] ss:$8 sps:$4 sm:$0xff]   ;;  %v975_v10 = vld [vmem:[#allocation7 + $0x50] ss:$8 sps:$4 sm:$0xff]  }
  0x68   : > { %476 = vmatpush1.bf16.msra.mxu0 %v969_v2  ;;  %v976_v11 = vld [vmem:[#allocation7 + $0x44] ss:$8 sps:$4 sm:$0xff]   ;;  %v978_v12 = vld [vmem:[#allocation7 + $0x40] ss:$8 sps:$4 sm:$0xff]   ;;  %v979_v13 = vld [vmem:[#allocation7 + $0x34] ss:$8 sps:$4 sm:$0xff]  }
  0x69   : > { %477 = vmatprep.subr.bf16.mxu0 %v970_v3  ;;  %v981_v14 = vld [vmem:[#allocation7 + $0x30] ss:$8 sps:$4 sm:$0xff]   ;;  %v982_v15 = vld [vmem:[#allocation7 + $0x24] ss:$8 sps:$4 sm:$0xff]   ;;  %v984_v17 = vld [vmem:[#allocation7 + $0x20] ss:$8 sps:$4 sm:$0xff]  }
  0x6a   : > { %v985_v18 = vld [vmem:[#allocation7 + $0x14] ss:$8 sps:$4 sm:$0xff]   ;;  %v987_v19 = vld [vmem:[#allocation7 + $0x10] ss:$8 sps:$4 sm:$0xff]   ;;  %v988_v20 = vld [vmem:[#allocation7 + $0x4] ss:$8 sps:$4 sm:$0xff]  }
  0x6b   : > { %v990_v21 = vld [vmem:[#allocation7] ss:$8 sps:$4 sm:$0xff]   ;;  %v991_v22 = vld [vmem:[#allocation8 + $0x78] sm:$0xff]   ;;  %v993_v24 = vld [vmem:[#allocation8 + $0x70] sm:$0xff]   ;;  %v386_v49 = vshrl.u32 %v385_v48, 7  ;;  %s860_s23 = sshll.u32 %s1260_s28, 7 }
  0x6c   : > { %478 = vmatpush1.bf16.msra.mxu0 %v972_v4  ;;  %v992_v23 = vld [vmem:[#allocation8 + $0x38] sm:$0xff]   ;;  %863 = vmatprep.subr.bf16.mxu1 %v991_v22  ;;  %v994_v25 = vld [vmem:[#allocation8 + $0x30] sm:$0xff]   ;;  %v995_v26 = vld [vmem:[#allocation8 + $0x68] sm:$0xff]   ;;  %s335_s29 = scalar_lea.vmem [#allocation10], %s819_s20  ;;  %s709_s14 = scalar_lea.hbm %s1443_s7, %s860_s23 }
  0x6d   : > { %479 = vmatprep.subr.bf16.mxu0 %v973_v9  ;;  %864 = vmatpush3.bf16.msra.mxu1 %v992_v23  ;;  %v996_v27 = vld [vmem:[#allocation8 + $0x28] sm:$0xff]   ;;  %v997_v28 = vld [vmem:[#allocation8 + $0x60] sm:$0xff]   ;;  %v999_v30 = vld [vmem:[#allocation8 + $0x58] sm:$0xff]   ;;  %v387_v50 = vsub.s32 0, %v386_v49  ;;  %v391_v52 = vsub.s32 1, %v386_v49  ;;  %s711_s10 = sshll.u32 %s335_s29, 4  ;;  %s712_s10 = int_to_ptr.vmem [resolvable:$true] %s711_s10 }
  0x6e   : > { %865 = vmatprep.subr.bf16.mxu1 %v993_v24  ;;  %v998_v29 = vld [vmem:[#allocation8 + $0x20] sm:$0xff]   ;;  %v1000_v31 = vld [vmem:[#allocation8 + $0x18] sm:$0xff]   ;;  %v1001_v32 = vld [vmem:[#allocation8 + $0x50] sm:$0xff]   ;;  %s698_s2 = scalar_lea.sflag [#allocation4], %s1372_s19  ;;  %s1115_s3 = scalar_lea.vmem %s712_s10, 128 }
  0x6f   : > { %v1002_v33 = vld [vmem:[#allocation8 + $0x10] sm:$0xff]   ;;  %v824_v38 = vld [vmem:[%s1437_s1] ss:$0 sm:$0xff]  ;;  %v1005_v46 = vld [vmem:[#allocation8 + $0x40] sm:$0xff]   ;;  %p1116_p0 = scmp.ne.s32.totalorder %s712_s10, %s1115_s3  ;;  %p1464_p12 = scmp.ne.s32.totalorder %s1456_s22, 0 }
  0x70   : > { %480 = vmatpush1.bf16.msra.mxu0 %v975_v10  ;;  %v1003_v44 = vld [vmem:[#allocation8 + $0x48] sm:$0xff]   ;;  %v1006_v47 = vld [vmem:[#allocation8] sm:$0xff]   ;;  %s1198_s30 = smov [#allocation10]  }
  0x71   : > { %481 = vmatprep.subr.bf16.mxu0 %v976_v11  ;;  %866 = vmatpush3.bf16.msra.mxu1 %v994_v25  ;;  %v1004_v45 = vld [vmem:[#allocation8 + $0x8] sm:$0xff]   ;;  %p1117_p7 = pnand %p1116_p0, %p1464_p12  ;;  %s1119_s28 = sshll.u32 %s1198_s30, 4  ;;  %s1120_s28 = int_to_ptr.vmem [resolvable:$false] %s1119_s28 }
  0x72   : > { %867 = vmatprep.subr.bf16.mxu1 %v995_v26  ;;  %v383_v51 = vld [vmem:[%s1440_s4] sm:$0x3]  ;;  %s1121_s20 = scalar_lea.vmem %s1120_s28, 256  ;;  %p1122_p10 = scmp.lt.s32.totalorder %s712_s10, %s1120_s28 }
  0x73   : > { %v388_v53 = vrot.slane %v383_v51, %v387_v50  ;;  %v392_v54 = vrot.slane %v383_v51, %v391_v52  ;;  %v842_v2 = vld [vmem:[%s1442_s6] ss:$0 sm:$0xff]  ;;  %p1118_p1 = pneg %p1117_p7  ;;  %p1123_p13 = scmp.lt.s32.totalorder %s1121_s20, %s1115_s3 }
  0x74   : > { %482 = vmatpush1.bf16.msra.mxu0 %v978_v12 }
  0x75   : > { %483 = vmatprep.subr.bf16.mxu0 %v979_v13  ;;  %868 = vmatpush3.bf16.msra.mxu1 %v996_v27  ;;  %p1124_p2 = por %p1123_p13, %p1122_p10 }
  0x76   : > { %869 = vmatprep.subr.bf16.mxu1 %v997_v28 }
  0x77   : > { %p1125_p3 = pnand %p1124_p2, %p1118_p1 }
  0x78   : > { %484 = vmatpush1.bf16.msra.mxu0 %v981_v14 }
  0x79   : > { %485 = vmatprep.subr.bf16.mxu0 %v982_v15  ;;  %870 = vmatpush3.bf16.msra.mxu1 %v998_v29 }
  0x7a   : > { %871 = vmatprep.subr.bf16.mxu1 %v999_v30 }
  0x7c   : > { %486 = vmatpush1.bf16.msra.mxu0 %v984_v17 }
  0x7d   : > { %487 = vmatprep.subr.bf16.mxu0 %v985_v18  ;;  %872 = vmatpush3.bf16.msra.mxu1 %v1000_v31 }
  0x7e   : > { %873 = vmatprep.subr.bf16.mxu1 %v1001_v32 }
  0x80   : > { %488 = vmatpush1.bf16.msra.mxu0 %v987_v19 }
  0x81   : > { %489 = vmatprep.subr.bf16.mxu0 %v988_v20  ;;  %874 = vmatpush3.bf16.msra.mxu1 %v1002_v33 }
  0x82   : > { %875 = vmatprep.subr.bf16.mxu1 %v1003_v44 }
  0x84   : > { %490 = vmatpush1.bf16.msra.mxu0 %v990_v21 }
  0x85   : > { %876 = vmatpush3.bf16.msra.mxu1 %v1004_v45 }
  0x86   : > { %877 = vmatprep.subr.bf16.mxu1 %v1005_v46 }
  0x89   : > { %878 = vmatpush3.bf16.msra.mxu1 %v1006_v47 }
  0xef   : > { %v339_v5 = vpop.xlane.xlu0 %338 }
  0xf0   : > { %v341_v6 = vmul.f32 0.0078125, %v339_v5 }
  0xf2   : > { %v342_v7 = vsub.f32 %v337_v0, %v341_v6 }
  0xf4   : > { %v343_v8 = vmul.f32 %v342_v7, %v342_v7 }
  0xf6   : > { %344 = vadd.xlane.f32.xlu0 %v343_v8 }
 0x17f   : > { %v345_v34 = vpop.xlane.xlu0 %344 }
 0x180   : > { %v346_v35 = vmul.f32 0.0078125, %v345_v34 }
 0x182   : > { %v347_v36 = vadd.f32 1e-06, %v346_v35 }
 0x184   : > { %1007 = vrsqrt.f32 %v347_v36 }
 0x191   : > { %v1008_v37 = vpop.eup %1007 }
 0x192   : > { %v349_v39 = vmul.f32 %v1008_v37, %v342_v7 }
 0x194   : > { %v357_v41 = vmul.f32 %v824_v38, %v349_v39 }
 0x196   : > { %v365_v42 = vadd.f32 %v825_v40, %v357_v41 }
 0x198   : > { %v366_v43 = vpack.c.bf16 %v365_v42, %v365_v42 }
 0x19a   : > { %508 = vmatmul.mubr.bf16.vlgmr.msra.gmra.mxu0 %v366_v43 }
 0x25a   : > { %v509_v55 = vpop.f32.mrf.mxu0 }
 0x25b   : > { %v510_v56 = vadd.f32 %v509_v55, %v388_v53 }
 0x25c   : > { %v511_v57 = vpop.f32.mrf.mxu0 }
 0x25d   : > { %v512_v58 = vadd.f32 %v511_v57, %v392_v54  ;;  %v516_v59 = vmax.f32 %v510_v56, 0.0 }
 0x25e   : > { %v513_v60 = vpop.f32.mrf.mxu0 }
 0x25f   : > { %v517_v61 = vmax.f32 %v512_v58, 0.0  ;;  %v518_v0 = vpack.c.bf16 %v516_v59, %v516_v59 }
 0x260   : > { %v514_v62 = vpop.f32.mrf.mxu0 }
 0x261   : > { %v519_v63 = vpack.c.bf16 %v517_v61, %v517_v61 }
 0x263   : > { %687 = vmatprep.mubr.bf16.mxu1 %v519_v63 }
 0x264   : > { %688 = vmatmul.mubr.bf16.vlgmr.msra.gmra.mxu1 %v518_v0 }
 0x324   : > { %v879_v1 = vpop.f32.mrf.mxu1 }
 0x326   : > { %v880_v3 = vpop.f32.mrf.mxu1 }
 0x327   : > { %v881_v4 = vadd.f32 %v880_v3, %v879_v1 }
 0x328   : > { %v882_v5 = vpop.f32.mrf.mxu1 }
 0x329   : > { %v690_v6 = vadd.f32 %v881_v4, %v842_v2 }
 0x32a   : > { %v883_v7 = vpop.f32.mrf.mxu1 }
 0x32b   : > { %v695_v8 = vadd.f32 %v690_v6, %v365_v42 }
 0x32d   : > { %696 = vst [vmem:[%s335_s29] sm:$0xff] %v695_v8 }
 0x32e   : > { %1128 = shalt.err (!%p1125_p3)
}
 0x32f   : > { %s1129_s9 = scalar_lea.hbm %s709_s14, 128  ;;  %s1133_s13 = scalar_lea.hbm %s1443_s7, 256 }
 0x330   : > { %p1130_p9 = scmp.ne.s32.totalorder %s709_s14, %s1129_s9  ;;  %p1134_p8 = scmp.lt.s32.totalorder %s709_s14, %s1443_s7 }
 0x331   : > { %p1135_p5 = scmp.lt.s32.totalorder %s1133_s13, %s1129_s9 }
 0x332   : > { %p1131_p4 = pnand %p1130_p9, %p1464_p12 }
 0x333   : > { %p1136_p11 = por %p1135_p5, %p1134_p8 }
 0x334   : > { %p1132_p6 = pneg %p1131_p4 }
 0x336   : > { %p1137_p0 = pnand %p1136_p11, %p1132_p6 }
 0x338   : > { %1140 = shalt.err (!%p1137_p0)
}
 0x339   : > { %899 = dma.vmem_to_hbm [thread:$0]  (%p1464_p12), %s712_s10, 128, %s709_s14, %s698_s2  }
 0x33a PF: > { %s723_s23 = sand.u32 1, %s1175_s24   ;;  %p1465_p7 = scmp.ne.s32.totalorder %s1451_s8, 0 }
 0x33b   : > { %p1466_p1 = scmp.ge.s32.totalorder %s1187_s27, 2  ;;  %s724_s29 = scalar_lea.sflag [#allocation4], %s723_s23 }
 0x33d   : > { %p916_p10 = pnand %p1466_p1, %p1465_p7 }
 0x33f   : > { %p917_p13 = pneg %p916_p10 }
 0x341   : > { %1170 = dma.done.wait (%p917_p13), %s724_s29, 128  }
 0x342   : > { %1172 = vsyncadd (%p917_p13), %s724_s29, 4294967168  ;;  %p22_p2 = scmp.ge.s32.totalorder %s1326_s18, 4   ;;  %s1467_s24 = smov %s1179_s25 }
 0x343   : > { %s1468_s25 = smov %s1183_s26  ;;  %s1469_s26 = smov %s1336_s21 }
 0x344   : > { %s1470_s27 = smov %s1326_s18  ;;  %24 = sbr.rel (!%p22_p2) target bundleno = 10 (0xa), region = 105 }
 0x349   :  { %729 = vsyncpa [#allocation3], 1 }
 0x34a   :  { %731 = vsyncpa [#allocation3 + $0x1], 1 }
 0x34b   :  { %732 = vsyncpa [#allocation6], 1 }
 0x34c   :  { %733 = vsyncpa [#allocation9], 1 }
 0x34d   :  { %734 = vsyncpa [#allocation4], 1 }
 0x34e   :  { %736 = vsyncpa [#allocation4 + $0x1], 1 }

</bundles_post_ra>
